<compile_context>
chip_gen: v5e
topology: v5e:2x2
jax: 0.10.0
libtpu: 0.0.40
codegen_flags: <defaults>
</compile_context>

<pallas_src>
import jax
import jax.numpy as jnp
from jax.experimental import pallas as pl
from jax.experimental.pallas import tpu as pltpu


def _round_up(x, m):
    return ((x + m - 1) // m) * m


# ---------------------------------------------------------------------------
# Pallas kernel: full-sequence L-layer GRU recurrence + batched decode.
# Everything (signals, h0, fused weights, output) is VMEM resident; no grid.
# ---------------------------------------------------------------------------
def _gru_decode_kernel(sig_ref, h0_ref, *rest):
    # rest = [W_fused_l, b_fused_l] * L + [w_dec, b_dec] + out_ref + hseq_scratch
    seq, BP, _ = sig_ref.shape          # (seq, BP, IP)
    L, _, HP = h0_ref.shape             # (L, BP, HP)
    n_w = 2 * L + 2
    w_refs = rest[:n_w]
    out_ref = rest[n_w]                 # (seq*BP, OP)
    hseq_ref = rest[n_w + 1]            # (seq, BP, HP) VMEM scratch

    def step(t, hs):
        inp = sig_ref[t]                                     # (BP, IP)
        new_hs = []
        for l in range(L):
            h_prev = hs[l]                                   # (BP, HP)
            # One fused MXU contraction per layer: [x | h] @ [r | z | n_i | n_h]
            xh = jnp.concatenate([inp, h_prev], axis=-1)     # (BP, Dp+HP)
            g = (jnp.dot(xh, w_refs[2 * l][...],
                         preferred_element_type=jnp.float32)
                 + w_refs[2 * l + 1][...])                   # (BP, 4*HP)
            # Gate blocks are 128-lane aligned -> no lane-shift relayouts.
            r = jax.nn.sigmoid(g[:, 0:HP])
            z = jax.nn.sigmoid(g[:, HP:2 * HP])
            n = jnp.tanh(g[:, 2 * HP:3 * HP] + r * g[:, 3 * HP:4 * HP])
            h_new = (1.0 - z) * n + z * h_prev
            new_hs.append(h_new)
            inp = h_new
        hseq_ref[t] = inp                                    # top-layer hidden
        return tuple(new_hs)

    # Hidden state is carried in vregs across the time loop.
    jax.lax.fori_loop(0, seq, step, tuple(h0_ref[l] for l in range(L)))

    # Batched, lane-dense decode over the full sequence (single wide store).
    hs_flat = hseq_ref[...].reshape(seq * BP, HP)
    w_dec = w_refs[2 * L][...]
    b_dec = w_refs[2 * L + 1][...]
    out_ref[...] = (jnp.dot(hs_flat, w_dec, preferred_element_type=jnp.float32)
                    + b_dec)


# ---------------------------------------------------------------------------
# Parameter construction (deterministic, torch-Linear/GRU shaped).
# ---------------------------------------------------------------------------
def init_params(key, num_states, num_inputs, hidden, num_layers, num_outputs):
    def u(k, shape, fan):
        bound = 1.0 / jnp.sqrt(jnp.float32(fan))
        return jax.random.uniform(k, shape, jnp.float32, -bound, bound)

    keys = iter(jax.random.split(key, 4 + 4 * num_layers + 2))
    p = {}
    # embed: Linear(num_states -> hidden * num_layers); torch weight is (out, in)
    p["embed_w"] = u(next(keys), (hidden * num_layers, num_states), num_states)
    p["embed_b"] = u(next(keys), (hidden * num_layers,), num_states)
    # GRU layers: weight_ih (3H, in), weight_hh (3H, H), biases (3H,); gate order r,z,n
    p["gru"] = []
    for l in range(num_layers):
        in_dim = num_inputs if l == 0 else hidden
        p["gru"].append(dict(
            w_ih=u(next(keys), (3 * hidden, in_dim), hidden),
            w_hh=u(next(keys), (3 * hidden, hidden), hidden),
            b_ih=u(next(keys), (3 * hidden,), hidden),
            b_hh=u(next(keys), (3 * hidden,), hidden),
        ))
    # decode: Linear(hidden -> num_outputs)
    p["dec_w"] = u(next(keys), (num_outputs, hidden), hidden)
    p["dec_b"] = u(next(keys), (num_outputs,), hidden)
    return p


# ---------------------------------------------------------------------------
# Forward wrapper (glue: masking + embed + padding; Pallas: recurrence + decode).
# ---------------------------------------------------------------------------
def masked_rnn_forward(states, signals, params, *, state_idx, input_idx,
                       hidden, num_layers, num_outputs):
    controlled = len(input_idx) > 0
    B = states.shape[0]
    seq = signals.shape[0]
    H, L, O = hidden, num_layers, num_outputs

    # Mask = column selection (embed input dim == len(state_idx)).
    x = states[:, jnp.asarray(state_idx)]                       # (B, num_states)
    h0_flat = x @ params["embed_w"].T + params["embed_b"]       # (B, H*L)
    # match torch: view(-1, H, L).permute(-1, 0, 1)
    h0 = h0_flat.reshape(B, H, L).transpose(2, 0, 1)            # (L, B, H)

    if controlled:
        sig = signals[..., jnp.asarray(input_idx)]              # (seq, B, num_inputs)
    else:
        sig = jnp.zeros_like(signals[..., :1])                  # (seq, B, 1)
    I = sig.shape[-1]

    # ---- TPU-friendly padding: 8-sublane batch, 128-lane gate/feature blocks ----
    BP = _round_up(B, 8)
    HP = _round_up(H, 128)
    IP = _round_up(I, 128)
    OP = _round_up(O, 128)

    sig_p = jnp.zeros((seq, BP, IP), jnp.float32).at[:, :B, :I].set(
        sig.astype(jnp.float32))
    h0_p = jnp.zeros((L, BP, HP), jnp.float32).at[:, :B, :H].set(
        h0.astype(jnp.float32))

    args = [sig_p, h0_p]
    for l in range(L):
        g = params["gru"][l]
        din = I if l == 0 else H
        dp = IP if l == 0 else HP
        w_ih_t = g["w_ih"].T.astype(jnp.float32)                # (din, 3H)
        w_hh_t = g["w_hh"].T.astype(jnp.float32)                # (H, 3H)
        # Fused block weight: rows [x | h], columns [r | z | n_i | n_h] (128-padded).
        W = jnp.zeros((dp + HP, 4 * HP), jnp.float32)
        W = W.at[:din, 0:H].set(w_ih_t[:, 0:H])                       # r (input)
        W = W.at[dp:dp + H, 0:H].set(w_hh_t[:, 0:H])                  # r (hidden)
        W = W.at[:din, HP:HP + H].set(w_ih_t[:, H:2 * H])             # z (input)
        W = W.at[dp:dp + H, HP:HP + H].set(w_hh_t[:, H:2 * H])        # z (hidden)
        W = W.at[:din, 2 * HP:2 * HP + H].set(w_ih_t[:, 2 * H:3 * H])       # n_i
        W = W.at[dp:dp + H, 3 * HP:3 * HP + H].set(w_hh_t[:, 2 * H:3 * H])  # n_h

        b = jnp.zeros((1, 4 * HP), jnp.float32)
        b = b.at[0, 0:H].set(g["b_ih"][0:H] + g["b_hh"][0:H])
        b = b.at[0, HP:HP + H].set(g["b_ih"][H:2 * H] + g["b_hh"][H:2 * H])
        b = b.at[0, 2 * HP:2 * HP + H].set(g["b_ih"][2 * H:3 * H])
        b = b.at[0, 3 * HP:3 * HP + H].set(g["b_hh"][2 * H:3 * H])
        args += [W, b]

    w_dec_p = jnp.zeros((HP, OP), jnp.float32).at[:H, :O].set(
        params["dec_w"].T.astype(jnp.float32))
    b_dec_p = jnp.zeros((1, OP), jnp.float32).at[0, :O].set(
        params["dec_b"].astype(jnp.float32))
    args += [w_dec_p, b_dec_p]

    vmem_spec = pl.BlockSpec(memory_space=pltpu.MemorySpace.VMEM)
    out = pl.pallas_call(
        _gru_decode_kernel,
        out_shape=jax.ShapeDtypeStruct((seq * BP, OP), jnp.float32),
        in_specs=[vmem_spec] * len(args),
        out_specs=vmem_spec,
        scratch_shapes=[pltpu.VMEM((seq, BP, HP), jnp.float32)],
    )(*args)

    return out.reshape(seq, BP, OP)[:, :B, :O]


# ---------------------------------------------------------------------------
# Pure-JAX reference (mirrors torch.nn.GRU semantics) for a correctness check.
# ---------------------------------------------------------------------------
def masked_rnn_reference(states, signals, params, *, state_idx, input_idx,
                         hidden, num_layers, num_outputs):
    B = states.shape[0]
    H, L = hidden, num_layers
    x = states[:, jnp.asarray(state_idx)]
    h0_flat = x @ params["embed_w"].T + params["embed_b"]
    h0 = h0_flat.reshape(B, H, L).transpose(2, 0, 1)
    sig = (signals[..., jnp.asarray(input_idx)] if len(input_idx) > 0
           else jnp.zeros_like(signals[..., :1]))

    seq_in = sig
    for l in range(L):
        g = params["gru"][l]

        def step(h, xt, g=g):
            gi = xt @ g["w_ih"].T + g["b_ih"]
            gh = h @ g["w_hh"].T + g["b_hh"]
            r = jax.nn.sigmoid(gi[:, :H] + gh[:, :H])
            z = jax.nn.sigmoid(gi[:, H:2 * H] + gh[:, H:2 * H])
            n = jnp.tanh(gi[:, 2 * H:] + r * gh[:, 2 * H:])
            h_new = (1.0 - z) * n + z * h
            return h_new, h_new

        _, seq_in = jax.lax.scan(step, h0[l], seq_in)
    return seq_in @ params["dec_w"].T + params["dec_b"]


if __name__ == "__main__":
    # module config
    tot_num_states, tot_num_signals = 6, 5
    state_idx = [0, 2, 3, 5]        # states list -> num_states = 4
    input_idx = [1, 3, 4]           # inputs list -> num_inputs = 3 (controlled)
    net_config = dict(num_hidden=32, num_layers=2, rnn_type="gru", dropout_prob=0.0)
    num_outputs = 1
    batch, seq = 2, 8
    H, L = net_config["num_hidden"], net_config["num_layers"]

    key = jax.random.PRNGKey(0)
    k_states, k_signals, k_params = jax.random.split(key, 3)
    states = jax.random.normal(k_states, (batch, tot_num_states), jnp.float32)
    signals = jax.random.normal(k_signals, (seq, batch, tot_num_signals), jnp.float32)
    params = init_params(k_params, len(state_idx), max(1, len(input_idx)),
                         H, L, num_outputs)

    out = masked_rnn_forward(states, signals, params,
                             state_idx=state_idx, input_idx=input_idx,
                             hidden=H, num_layers=L, num_outputs=num_outputs)
    out = jax.block_until_ready(out)

    ref = masked_rnn_reference(states, signals, params,
                               state_idx=state_idx, input_idx=input_idx,
                               hidden=H, num_layers=L, num_outputs=num_outputs)
    assert out.shape == (seq, batch, num_outputs)
    assert jnp.allclose(out, ref, atol=1e-4, rtol=1e-4)
    print("KERNEL_OK")
</pallas_src>

<mosaic_0001>
module attributes {stable_mosaic.version = 11 : i64} {
  func.func @_gru_decode_kernel(%arg0: memref<8x8x128xf32, #tpu.memory_space<vmem>>, %arg1: memref<2x8x128xf32, #tpu.memory_space<vmem>>, %arg2: memref<256x512xf32, #tpu.memory_space<vmem>>, %arg3: memref<1x512xf32, #tpu.memory_space<vmem>>, %arg4: memref<256x512xf32, #tpu.memory_space<vmem>>, %arg5: memref<1x512xf32, #tpu.memory_space<vmem>>, %arg6: memref<128x128xf32, #tpu.memory_space<vmem>>, %arg7: memref<1x128xf32, #tpu.memory_space<vmem>>, %arg8: memref<64x128xf32, #tpu.memory_space<vmem>>, %arg9: memref<8x8x128xf32, #tpu.memory_space<vmem>>) attributes {dimension_semantics = [], scalar_prefetch = 0 : i64, scratch_operands = 1 : i64, tpu.core_type = #tpu.core_type<tc>} {
    %c0 = arith.constant 0 : index
    %c0_0 = arith.constant 0 : index
    %c0_1 = arith.constant 0 : index
    %0 = vector.load %arg1[%c0, %c0_0, %c0_1] : memref<2x8x128xf32, #tpu.memory_space<vmem>>, vector<1x8x128xf32>
    %1 = vector.shape_cast %0 : vector<1x8x128xf32> to vector<8x128xf32>
    %c1 = arith.constant 1 : index
    %c0_2 = arith.constant 0 : index
    %c0_3 = arith.constant 0 : index
    %2 = vector.load %arg1[%c1, %c0_2, %c0_3] : memref<2x8x128xf32, #tpu.memory_space<vmem>>, vector<1x8x128xf32>
    %3 = vector.shape_cast %2 : vector<1x8x128xf32> to vector<8x128xf32>
    %c0_i32 = arith.constant 0 : i32
    %c8_i32 = arith.constant 8 : i32
    %4 = arith.addi %c0_i32, %c8_i32 : i32
    %c1_i32 = arith.constant 1 : i32
    %5:2 = scf.for %arg10 = %c0_i32 to %4 step %c1_i32 iter_args(%arg11 = %1, %arg12 = %3) -> (vector<8x128xf32>, vector<8x128xf32>)  : i32 {
      %14 = arith.index_cast %arg10 : i32 to index
      %c0_14 = arith.constant 0 : index
      %c0_15 = arith.constant 0 : index
      %15 = vector.load %arg0[%14, %c0_14, %c0_15] : memref<8x8x128xf32, #tpu.memory_space<vmem>>, vector<1x8x128xf32>
      %16 = vector.shape_cast %15 : vector<1x8x128xf32> to vector<8x128xf32>
      %17 = tpu.concatenate %16, %arg11 in 1 : vector<8x128xf32>, vector<8x128xf32> -> vector<8x256xf32>
      %c0_16 = arith.constant 0 : index
      %c0_17 = arith.constant 0 : index
      %18 = vector.load %arg2[%c0_16, %c0_17] : memref<256x512xf32, #tpu.memory_space<vmem>>, vector<256x512xf32>
      %cst_18 = arith.constant dense<0.000000e+00> : vector<8x512xf32>
      %19 = tpu.matmul %17, %18, %cst_18 {dimension_numbers = #tpu.dot_dimension_numbers<[1], [0], [0], [1], [0, 0, 1, 1], [], []>} : vector<8x256xf32>, vector<256x512xf32>, vector<8x512xf32> -> vector<8x512xf32>
      %c0_19 = arith.constant 0 : index
      %c0_20 = arith.constant 0 : index
      %20 = vector.load %arg3[%c0_19, %c0_20] : memref<1x512xf32, #tpu.memory_space<vmem>>, vector<1x512xf32>
      %21 = vector.broadcast %20 : vector<1x512xf32> to vector<8x512xf32>
      %22 = arith.addf %19, %21 : vector<8x512xf32>
      %23 = vector.extract_strided_slice %22 {offsets = [0, 0], sizes = [8, 128], strides = [1, 1]} : vector<8x512xf32> to vector<8x128xf32>
      %24 = arith.negf %23 : vector<8x128xf32>
      %25 = math.exp %24 : vector<8x128xf32>
      %cst_21 = arith.constant 1.000000e+00 : f32
      %26 = vector.broadcast %cst_21 : f32 to vector<8x128xf32>
      %27 = arith.addf %26, %25 : vector<8x128xf32>
      %28 = arith.divf %26, %27 : vector<8x128xf32>
      %29 = vector.extract_strided_slice %22 {offsets = [0, 128], sizes = [8, 128], strides = [1, 1]} : vector<8x512xf32> to vector<8x128xf32>
      %30 = arith.negf %29 : vector<8x128xf32>
      %31 = math.exp %30 : vector<8x128xf32>
      %cst_22 = arith.constant 1.000000e+00 : f32
      %32 = vector.broadcast %cst_22 : f32 to vector<8x128xf32>
      %33 = arith.addf %32, %31 : vector<8x128xf32>
      %34 = arith.divf %32, %33 : vector<8x128xf32>
      %35 = vector.extract_strided_slice %22 {offsets = [0, 256], sizes = [8, 128], strides = [1, 1]} : vector<8x512xf32> to vector<8x128xf32>
      %36 = vector.extract_strided_slice %22 {offsets = [0, 384], sizes = [8, 128], strides = [1, 1]} : vector<8x512xf32> to vector<8x128xf32>
      %37 = arith.mulf %28, %36 : vector<8x128xf32>
      %38 = arith.addf %35, %37 : vector<8x128xf32>
      %39 = math.tanh %38 : vector<8x128xf32>
      %cst_23 = arith.constant 1.000000e+00 : f32
      %40 = vector.broadcast %cst_23 : f32 to vector<8x128xf32>
      %41 = arith.subf %40, %34 : vector<8x128xf32>
      %42 = arith.mulf %41, %39 : vector<8x128xf32>
      %43 = arith.mulf %34, %arg11 : vector<8x128xf32>
      %44 = arith.addf %42, %43 : vector<8x128xf32>
      %45 = tpu.concatenate %44, %arg12 in 1 : vector<8x128xf32>, vector<8x128xf32> -> vector<8x256xf32>
      %c0_24 = arith.constant 0 : index
      %c0_25 = arith.constant 0 : index
      %46 = vector.load %arg4[%c0_24, %c0_25] : memref<256x512xf32, #tpu.memory_space<vmem>>, vector<256x512xf32>
      %cst_26 = arith.constant dense<0.000000e+00> : vector<8x512xf32>
      %47 = tpu.matmul %45, %46, %cst_26 {dimension_numbers = #tpu.dot_dimension_numbers<[1], [0], [0], [1], [0, 0, 1, 1], [], []>} : vector<8x256xf32>, vector<256x512xf32>, vector<8x512xf32> -> vector<8x512xf32>
      %c0_27 = arith.constant 0 : index
      %c0_28 = arith.constant 0 : index
      %48 = vector.load %arg5[%c0_27, %c0_28] : memref<1x512xf32, #tpu.memory_space<vmem>>, vector<1x512xf32>
      %49 = vector.broadcast %48 : vector<1x512xf32> to vector<8x512xf32>
      %50 = arith.addf %47, %49 : vector<8x512xf32>
      %51 = vector.extract_strided_slice %50 {offsets = [0, 0], sizes = [8, 128], strides = [1, 1]} : vector<8x512xf32> to vector<8x128xf32>
      %52 = arith.negf %51 : vector<8x128xf32>
      %53 = math.exp %52 : vector<8x128xf32>
      %cst_29 = arith.constant 1.000000e+00 : f32
      %54 = vector.broadcast %cst_29 : f32 to vector<8x128xf32>
      %55 = arith.addf %54, %53 : vector<8x128xf32>
      %56 = arith.divf %54, %55 : vector<8x128xf32>
      %57 = vector.extract_strided_slice %50 {offsets = [0, 128], sizes = [8, 128], strides = [1, 1]} : vector<8x512xf32> to vector<8x128xf32>
      %58 = arith.negf %57 : vector<8x128xf32>
      %59 = math.exp %58 : vector<8x128xf32>
      %cst_30 = arith.constant 1.000000e+00 : f32
      %60 = vector.broadcast %cst_30 : f32 to vector<8x128xf32>
      %61 = arith.addf %60, %59 : vector<8x128xf32>
      %62 = arith.divf %60, %61 : vector<8x128xf32>
      %63 = vector.extract_strided_slice %50 {offsets = [0, 256], sizes = [8, 128], strides = [1, 1]} : vector<8x512xf32> to vector<8x128xf32>
      %64 = vector.extract_strided_slice %50 {offsets = [0, 384], sizes = [8, 128], strides = [1, 1]} : vector<8x512xf32> to vector<8x128xf32>
      %65 = arith.mulf %56, %64 : vector<8x128xf32>
      %66 = arith.addf %63, %65 : vector<8x128xf32>
      %67 = math.tanh %66 : vector<8x128xf32>
      %cst_31 = arith.constant 1.000000e+00 : f32
      %68 = vector.broadcast %cst_31 : f32 to vector<8x128xf32>
      %69 = arith.subf %68, %62 : vector<8x128xf32>
      %70 = arith.mulf %69, %67 : vector<8x128xf32>
      %71 = arith.mulf %62, %arg12 : vector<8x128xf32>
      %72 = arith.addf %70, %71 : vector<8x128xf32>
      %73 = arith.index_cast %arg10 : i32 to index
      %c0_32 = arith.constant 0 : index
      %c0_33 = arith.constant 0 : index
      %74 = vector.load %arg9[%73, %c0_32, %c0_33] : memref<8x8x128xf32, #tpu.memory_space<vmem>>, vector<1x8x128xf32>
      %75 = vector.shape_cast %74 : vector<1x8x128xf32> to vector<8x128xf32>
      %76 = vector.shape_cast %72 : vector<8x128xf32> to vector<1x8x128xf32>
      tpu.vector_store %arg9[%73, %c0_32, %c0_33], %76 {strides = array<i32>} : memref<8x8x128xf32, #tpu.memory_space<vmem>>, vector<1x8x128xf32>,
      scf.yield %44, %72 : vector<8x128xf32>, vector<8x128xf32>
    }
    %c8_i32_4 = arith.constant 8 : i32
    %c0_5 = arith.constant 0 : index
    %c0_6 = arith.constant 0 : index
    %c0_7 = arith.constant 0 : index
    %6 = vector.load %arg9[%c0_5, %c0_6, %c0_7] : memref<8x8x128xf32, #tpu.memory_space<vmem>>, vector<8x8x128xf32>
    %7 = vector.shape_cast %6 : vector<8x8x128xf32> to vector<64x128xf32>
    %c0_8 = arith.constant 0 : index
    %c0_9 = arith.constant 0 : index
    %8 = vector.load %arg6[%c0_8, %c0_9] : memref<128x128xf32, #tpu.memory_space<vmem>>, vector<128x128xf32>
    %c0_10 = arith.constant 0 : index
    %c0_11 = arith.constant 0 : index
    %9 = vector.load %arg7[%c0_10, %c0_11] : memref<1x128xf32, #tpu.memory_space<vmem>>, vector<1x128xf32>
    %cst = arith.constant dense<0.000000e+00> : vector<64x128xf32>
    %10 = tpu.matmul %7, %8, %cst {dimension_numbers = #tpu.dot_dimension_numbers<[1], [0], [0], [1], [0, 0, 1, 1], [], []>} : vector<64x128xf32>, vector<128x128xf32>, vector<64x128xf32> -> vector<64x128xf32>
    %11 = vector.broadcast %9 : vector<1x128xf32> to vector<64x128xf32>
    %12 = arith.addf %10, %11 : vector<64x128xf32>
    %c0_12 = arith.constant 0 : index
    %c0_13 = arith.constant 0 : index
    %13 = vector.load %arg8[%c0_12, %c0_13] : memref<64x128xf32, #tpu.memory_space<vmem>>, vector<64x128xf32>
    tpu.vector_store %arg8[%c0_12, %c0_13], %12 {strides = array<i32>} : memref<64x128xf32, #tpu.memory_space<vmem>>, vector<64x128xf32>,
    return
  }
}

</mosaic_0001>

<bundles_post_ra>
// kernel: tpu_custom_call.1
= control target key start
LH: loop header
LB: loop body
LE: loop exit
PB: predicated region body
PF: predicated region fallthrough
CT: control target
= control target key end

     0   :  { %13 = vsyncpa [#allocation4], 0  ;;  %s1428_s0 = inlined_call_operand.hbm [shape: f32[8,8,128], index: 0, kind: input, shape index: {}]   ;;  %s1429_s1 = inlined_call_operand.hbm [shape: f32[2,8,128], index: 1, kind: input, shape index: {}]   ;;  %s1430_s2 = inlined_call_operand.hbm [shape: f32[256,512], index: 2, kind: input, shape index: {}]   ;;  %s1431_s3 = inlined_call_operand.hbm [shape: f32[1,512], index: 3, kind: input, shape index: {}]   ;;  %s1432_s4 = inlined_call_operand.hbm [shape: f32[256,512], index: 4, kind: input, shape index: {}]   ;;  %s1433_s5 = inlined_call_operand.vmem [shape: f32[1,512], index: 5, kind: input, shape index: {}]   ;;  %s1434_s6 = inlined_call_operand.hbm [shape: f32[128,128], index: 6, kind: input, shape index: {}]   ;;  %s1435_s7 = inlined_call_operand.vmem [shape: f32[1,128], index: 7, kind: input, shape index: {}]   ;;  %s1436_s8 = inlined_call_operand.hbm [shape: f32[64,128], index: 8, kind: output, shape index: {}]  }
   0x1   :  { %14 = vsyncpa [#allocation7], 0 }
   0x2   :  { %15 = vsyncpa [#allocation10], 0 }
   0x3   :  { %16 = vsyncpa [#allocation13], 0 }
   0x4   :  { %17 = vsyncpa [#allocation5], 0  ;;  %s35_s29 = sshll.u32 %s1429_s1, 4  ;;  %s1249_s30 = smov [#allocation6]   ;;  %s36_s29 = int_to_ptr.hbm [resolvable:$true] %s35_s29 }
   0x5   :  { %s37_s9 = sshll.u32 %s1249_s30, 4  ;;  %s62_s12 = sshll.u32 %s1431_s3, 4  ;;  %s38_s9 = int_to_ptr.vmem [resolvable:$true] %s37_s9  ;;  %s63_s12 = int_to_ptr.hbm [resolvable:$true] %s62_s12 }
   0x6   :  { %s1250_s13 = smov 128   ;;  %s1251_s14 = smov 8  }
   0x7   :  { %43 = dma.hbm_to_vmem [thread:$0]  %s36_s29, 256, %s38_s9, [#allocation7], %s1250_s13, %s1250_s13, %s1251_s14  }
   0x8   :  { %s1252_s15 = smov [#allocation9]   ;;  %s22_s1 = sshll.u32 %s1428_s0, 4  ;;  %s23_s1 = int_to_ptr.hbm [resolvable:$true] %s22_s1 }
   0x9   :  { %s64_s16 = sshll.u32 %s1252_s15, 4  ;;  %s48_s3 = sshll.u32 %s1430_s2, 4  ;;  %s65_s16 = int_to_ptr.vmem [resolvable:$true] %s64_s16  ;;  %s49_s3 = int_to_ptr.hbm [resolvable:$true] %s48_s3 }
   0xa   :  { %67 = dma.hbm_to_vmem [thread:$0]  %s63_s12, 64, %s65_s16, [#allocation10]  }
   0xb   :  { %s1253_s21 = smov [#allocation3]   ;;  %s1254_s23 = smov [#allocation8]  }
   0xc   :  { %s24_s22 = sshll.u32 %s1253_s21, 4  ;;  %s50_s24 = sshll.u32 %s1254_s23, 4  ;;  %s25_s22 = int_to_ptr.vmem [resolvable:$true] %s24_s22  ;;  %s51_s24 = int_to_ptr.vmem [resolvable:$true] %s50_s24 }
   0xd   :  { %30 = dma.hbm_to_vmem [thread:$0]  %s23_s1, 1024, %s25_s22, [#allocation4], %s1250_s13, %s1250_s13, %s1251_s14  }
   0xe   :  { %s1255_s25 = smov 512   ;;  %s1256_s0 = smov 32  }
   0xf   :  { %56 = dma.hbm_to_vmem [thread:$0]  %s49_s3, 16384, %s51_s24, [#allocation7], %s1255_s25, %s1255_s25, %s1256_s0  }
  0x10   :  { %s72_s28 = sshll.u32 %s1432_s4, 4  ;;  %s1257_s2 = smov [#allocation11]   ;;  %s73_s28 = int_to_ptr.hbm [resolvable:$true] %s72_s28 }
  0x11   :  { %s74_s29 = sshll.u32 %s1257_s2, 4  ;;  %s87_s10 = sshll.u32 %s1434_s6, 4  ;;  %s75_s29 = int_to_ptr.vmem [resolvable:$true] %s74_s29  ;;  %s88_s10 = int_to_ptr.hbm [resolvable:$true] %s87_s10 }
  0x12   :  { %80 = dma.hbm_to_vmem [thread:$0]  %s73_s28, 16384, %s75_s29, [#allocation10], %s1255_s25, %s1255_s25, %s1256_s0  }
  0x13   :  { %s1258_s11 = smov [#allocation12]  }
  0x14   :  { %s89_s12 = sshll.u32 %s1258_s11, 4  ;;  %s90_s12 = int_to_ptr.vmem [resolvable:$true] %s89_s12 }
  0x15   :  { %95 = dma.hbm_to_vmem [thread:$0]  %s88_s10, 2048, %s90_s12, [#allocation13], %s1250_s13, %s1250_s13, %s1251_s14  }
  0x16   :  { %1227 = dma.done.wait [#allocation4], 1024  }
  0x17   :  { %1228 = vsyncadd [#allocation4], 4294966272 }
  0x18   :  { %1229 = dma.done.wait [#allocation7], 16640  }
  0x19   :  { %1230 = vsyncadd [#allocation7], 4294950656 }
  0x1a   :  { %1231 = dma.done.wait [#allocation10], 16448  }
  0x1b   :  { %1232 = vsyncadd [#allocation10], 4294950848 }
  0x1c   :  { %1233 = dma.done.wait [#allocation13], 2048  }
  0x1d   :  { %1234 = vsyncadd [#allocation13], 4294965248  ;;  %v122_v0 = vld [vmem:[#allocation6] sm:$0xff]   ;;  %v124_v1 = vld [vmem:[#allocation6 + $0x8] sm:$0xff]   ;;  %s1336_s4 = smov 0  }
  0x1e LB: > { %v196_v2 = vld [vmem:[#allocation8 + $0x1e0] sm:$0xff]  ;;  %v197_v3 = vld [vmem:[#allocation8 + $0x1e8] sm:$0xff]  ;;  %s938_s6 = sshll.u32 %s1247_s4, 3  ;;  %s130_s4 = sadd.s32 1, %s1247_s4   ;;  %s1247_s4 = sphi %s1336_s4, %s130_s4   ;;  %v1243_v0 = vphi %v122_v0, %v1399_v0   ;;  %v1239_v1 = vphi %v124_v1, %v821_v1  }
  0x1f   : > { %v192_v4 = vld [vmem:[#allocation8 + $0x1c0] sm:$0xff]  ;;  %274 = vmatpush.msra.mxu0 %v196_v2  ;;  %314 = vmatpush.msra.mxu2 %v197_v3  ;;  %v193_v6 = vld [vmem:[#allocation8 + $0x1c8] sm:$0xff]  ;;  %s134_s15 = scalar_lea.vmem [#allocation3], %s938_s6  ;;  %v199_v3 = vld [vmem:[#allocation8 + $0x1f8] sm:$0xff]  ;;  %s822_s18 = scalar_lea.vmem [#allocation2], %s938_s6 }
  0x20   : > { %v260_v5 = vld [vmem:[#allocation8 + $0x3e0] sm:$0xff]  ;;  %v261_v7 = vld [vmem:[#allocation8 + $0x3e8] sm:$0xff]  ;;  %v1350_v2 = vld [vmem:[%s134_s15] sm:$0xff]  ;;  %p127_p0 = scmp.ge.s32.totalorder %s130_s4, 8  }
  0x21   : > { %294 = vmatpush.msra.mxu1 %v260_v5  ;;  %334 = vmatpush.msra.mxu3 %v261_v7  ;;  %v188_v8 = vld [vmem:[#allocation8 + $0x1a0] sm:$0xff]  ;;  %v189_v10 = vld [vmem:[#allocation8 + $0x1a8] sm:$0xff]  ;;  %v263_v7 = vld [vmem:[#allocation8 + $0x3f8] sm:$0xff]  ;;  %s1259_s19 = smov (%p127_p0), [#allocation14]   ;;  %s907_s21 = sshll.u32 (%p127_p0), %s1436_s8, 4  ;;  %s908_s21 = int_to_ptr.hbm [resolvable:$true] %s907_s21 }
  0x22   : > { %v256_v9 = vld [vmem:[#allocation8 + $0x3c0] sm:$0xff]  ;;  %275 = vmatpush.msra.mxu0 %v192_v4  ;;  %315 = vmatpush.msra.mxu2 %v193_v6  ;;  %v257_v11 = vld [vmem:[#allocation8 + $0x3c8] sm:$0xff]  ;;  %v195_v6 = vld [vmem:[#allocation8 + $0x1d8] sm:$0xff]  ;;  %s905_s20 = sshll.u32 (%p127_p0), %s1259_s19, 4  ;;  %s906_s20 = int_to_ptr.vmem [resolvable:$true] %s905_s20 }
  0x23   : > { %v252_v12 = vld [vmem:[#allocation8 + $0x3a0] sm:$0xff]  ;;  %295 = vmatpush.msra.mxu1 %v256_v9  ;;  %335 = vmatpush.msra.mxu3 %v257_v11  ;;  %v185_v14 = vld [vmem:[#allocation8 + $0x188] sm:$0xff]  ;;  %v191_v9 = vld [vmem:[#allocation8 + $0x1b8] sm:$0xff] }
  0x24   : > { %v184_v13 = vld [vmem:[#allocation8 + $0x180] sm:$0xff]  ;;  %v253_v15 = vld [vmem:[#allocation8 + $0x3a8] sm:$0xff]  ;;  %276 = vmatpush.msra.mxu0 %v188_v8  ;;  %316 = vmatpush.msra.mxu2 %v189_v10  ;;  %v198_v8 = vld [vmem:[#allocation8 + $0x1f0] sm:$0xff] }
  0x25   : > { %v248_v16 = vld [vmem:[#allocation8 + $0x380] sm:$0xff]  ;;  %v249_v17 = vld [vmem:[#allocation8 + $0x388] sm:$0xff]  ;;  %296 = vmatpush.msra.mxu1 %v252_v12  ;;  %336 = vmatpush.msra.mxu3 %v253_v15  ;;  %v262_v10 = vld [vmem:[#allocation8 + $0x3f0] sm:$0xff] }
  0x26   : > { %v180_v18 = vld [vmem:[#allocation8 + $0x160] sm:$0xff]  ;;  %v181_v19 = vld [vmem:[#allocation8 + $0x168] sm:$0xff]  ;;  %277 = vmatpush.msra.mxu0 %v184_v13  ;;  %317 = vmatpush.msra.mxu2 %v185_v14  ;;  %v259_v11 = vld [vmem:[#allocation8 + $0x3d8] sm:$0xff] }
  0x27   : > { %v244_v20 = vld [vmem:[#allocation8 + $0x360] sm:$0xff]  ;;  %v245_v21 = vld [vmem:[#allocation8 + $0x368] sm:$0xff]  ;;  %297 = vmatpush.msra.mxu1 %v248_v16  ;;  %337 = vmatpush.msra.mxu3 %v249_v17  ;;  %v194_v12 = vld [vmem:[#allocation8 + $0x1d0] sm:$0xff] }
  0x28   : > { %v176_v22 = vld [vmem:[#allocation8 + $0x140] sm:$0xff]  ;;  %v177_v23 = vld [vmem:[#allocation8 + $0x148] sm:$0xff]  ;;  %278 = vmatpush.msra.mxu0 %v180_v18  ;;  %318 = vmatpush.msra.mxu2 %v181_v19  ;;  %v187_v13 = vld [vmem:[#allocation8 + $0x198] sm:$0xff] }
  0x29   : > { %v240_v24 = vld [vmem:[#allocation8 + $0x340] sm:$0xff]  ;;  %v241_v25 = vld [vmem:[#allocation8 + $0x348] sm:$0xff]  ;;  %298 = vmatpush.msra.mxu1 %v244_v20  ;;  %338 = vmatpush.msra.mxu3 %v245_v21  ;;  %v258_v14 = vld [vmem:[#allocation8 + $0x3d0] sm:$0xff] }
  0x2a   : > { %v172_v26 = vld [vmem:[#allocation8 + $0x120] sm:$0xff]  ;;  %v173_v27 = vld [vmem:[#allocation8 + $0x128] sm:$0xff]  ;;  %279 = vmatpush.msra.mxu0 %v176_v22  ;;  %319 = vmatpush.msra.mxu2 %v177_v23  ;;  %v255_v15 = vld [vmem:[#allocation8 + $0x3b8] sm:$0xff] }
  0x2b   : > { %v236_v28 = vld [vmem:[#allocation8 + $0x320] sm:$0xff]  ;;  %v237_v29 = vld [vmem:[#allocation8 + $0x328] sm:$0xff]  ;;  %299 = vmatpush.msra.mxu1 %v240_v24  ;;  %339 = vmatpush.msra.mxu3 %v241_v25  ;;  %v190_v16 = vld [vmem:[#allocation8 + $0x1b0] sm:$0xff] }
  0x2c   : > { %v168_v30 = vld [vmem:[#allocation8 + $0x100] sm:$0xff]  ;;  %v169_v31 = vld [vmem:[#allocation8 + $0x108] sm:$0xff]  ;;  %280 = vmatpush.msra.mxu0 %v172_v26  ;;  %320 = vmatpush.msra.mxu2 %v173_v27  ;;  %v183_v17 = vld [vmem:[#allocation8 + $0x178] sm:$0xff] }
  0x2d   : > { %v232_v32 = vld [vmem:[#allocation8 + $0x300] sm:$0xff]  ;;  %v233_v33 = vld [vmem:[#allocation8 + $0x308] sm:$0xff]  ;;  %300 = vmatpush.msra.mxu1 %v236_v28  ;;  %340 = vmatpush.msra.mxu3 %v237_v29  ;;  %v254_v18 = vld [vmem:[#allocation8 + $0x3b0] sm:$0xff] }
  0x2e   : > { %v164_v34 = vld [vmem:[#allocation8 + $0xe0] sm:$0xff]  ;;  %v165_v35 = vld [vmem:[#allocation8 + $0xe8] sm:$0xff]  ;;  %281 = vmatpush.msra.mxu0 %v168_v30  ;;  %321 = vmatpush.msra.mxu2 %v169_v31  ;;  %v251_v19 = vld [vmem:[#allocation8 + $0x398] sm:$0xff] }
  0x2f   : > { %v228_v36 = vld [vmem:[#allocation8 + $0x2e0] sm:$0xff]  ;;  %v229_v37 = vld [vmem:[#allocation8 + $0x2e8] sm:$0xff]  ;;  %301 = vmatpush.msra.mxu1 %v232_v32  ;;  %341 = vmatpush.msra.mxu3 %v233_v33  ;;  %v186_v20 = vld [vmem:[#allocation8 + $0x190] sm:$0xff] }
  0x30   : > { %v160_v38 = vld [vmem:[#allocation8 + $0xc0] sm:$0xff]  ;;  %v161_v39 = vld [vmem:[#allocation8 + $0xc8] sm:$0xff]  ;;  %282 = vmatpush.msra.mxu0 %v164_v34  ;;  %322 = vmatpush.msra.mxu2 %v165_v35  ;;  %v179_v21 = vld [vmem:[#allocation8 + $0x158] sm:$0xff] }
  0x31   : > { %v224_v40 = vld [vmem:[#allocation8 + $0x2c0] sm:$0xff]  ;;  %v225_v41 = vld [vmem:[#allocation8 + $0x2c8] sm:$0xff]  ;;  %302 = vmatpush.msra.mxu1 %v228_v36  ;;  %342 = vmatpush.msra.mxu3 %v229_v37  ;;  %v250_v22 = vld [vmem:[#allocation8 + $0x390] sm:$0xff] }
  0x32   : > { %v156_v42 = vld [vmem:[#allocation8 + $0xa0] sm:$0xff]  ;;  %v157_v43 = vld [vmem:[#allocation8 + $0xa8] sm:$0xff]  ;;  %283 = vmatpush.msra.mxu0 %v160_v38  ;;  %323 = vmatpush.msra.mxu2 %v161_v39  ;;  %v247_v23 = vld [vmem:[#allocation8 + $0x378] sm:$0xff] }
  0x33   : > { %v220_v44 = vld [vmem:[#allocation8 + $0x2a0] sm:$0xff]  ;;  %v221_v45 = vld [vmem:[#allocation8 + $0x2a8] sm:$0xff]  ;;  %303 = vmatpush.msra.mxu1 %v224_v40  ;;  %343 = vmatpush.msra.mxu3 %v225_v41  ;;  %v182_v24 = vld [vmem:[#allocation8 + $0x170] sm:$0xff] }
  0x34   : > { %v152_v46 = vld [vmem:[#allocation8 + $0x80] sm:$0xff]  ;;  %v153_v47 = vld [vmem:[#allocation8 + $0x88] sm:$0xff]  ;;  %284 = vmatpush.msra.mxu0 %v156_v42  ;;  %324 = vmatpush.msra.mxu2 %v157_v43  ;;  %v175_v25 = vld [vmem:[#allocation8 + $0x138] sm:$0xff] }
  0x35   : > { %v216_v48 = vld [vmem:[#allocation8 + $0x280] sm:$0xff]  ;;  %v217_v49 = vld [vmem:[#allocation8 + $0x288] sm:$0xff]  ;;  %304 = vmatpush.msra.mxu1 %v220_v44  ;;  %344 = vmatpush.msra.mxu3 %v221_v45  ;;  %v246_v26 = vld [vmem:[#allocation8 + $0x370] sm:$0xff] }
  0x36   : > { %v148_v50 = vld [vmem:[#allocation8 + $0x60] sm:$0xff]  ;;  %v149_v51 = vld [vmem:[#allocation8 + $0x68] sm:$0xff]  ;;  %285 = vmatpush.msra.mxu0 %v152_v46  ;;  %325 = vmatpush.msra.mxu2 %v153_v47  ;;  %v243_v27 = vld [vmem:[#allocation8 + $0x358] sm:$0xff] }
  0x37   : > { %v212_v52 = vld [vmem:[#allocation8 + $0x260] sm:$0xff]  ;;  %v213_v53 = vld [vmem:[#allocation8 + $0x268] sm:$0xff]  ;;  %305 = vmatpush.msra.mxu1 %v216_v48  ;;  %345 = vmatpush.msra.mxu3 %v217_v49  ;;  %v178_v28 = vld [vmem:[#allocation8 + $0x150] sm:$0xff] }
  0x38   : > { %v144_v54 = vld [vmem:[#allocation8 + $0x40] sm:$0xff]  ;;  %v145_v55 = vld [vmem:[#allocation8 + $0x48] sm:$0xff]  ;;  %286 = vmatpush.msra.mxu0 %v148_v50  ;;  %326 = vmatpush.msra.mxu2 %v149_v51  ;;  %v171_v29 = vld [vmem:[#allocation8 + $0x118] sm:$0xff] }
  0x39   : > { %v208_v56 = vld [vmem:[#allocation8 + $0x240] sm:$0xff]  ;;  %v209_v57 = vld [vmem:[#allocation8 + $0x248] sm:$0xff]  ;;  %306 = vmatpush.msra.mxu1 %v212_v52  ;;  %346 = vmatpush.msra.mxu3 %v213_v53  ;;  %v242_v30 = vld [vmem:[#allocation8 + $0x350] sm:$0xff] }
  0x3a   : > { %v140_v58 = vld [vmem:[#allocation8 + $0x20] sm:$0xff]  ;;  %v141_v59 = vld [vmem:[#allocation8 + $0x28] sm:$0xff]  ;;  %287 = vmatpush.msra.mxu0 %v144_v54  ;;  %327 = vmatpush.msra.mxu2 %v145_v55  ;;  %v239_v31 = vld [vmem:[#allocation8 + $0x338] sm:$0xff] }
  0x3b   : > { %v204_v60 = vld [vmem:[#allocation8 + $0x220] sm:$0xff]  ;;  %v205_v61 = vld [vmem:[#allocation8 + $0x228] sm:$0xff]  ;;  %307 = vmatpush.msra.mxu1 %v208_v56  ;;  %347 = vmatpush.msra.mxu3 %v209_v57  ;;  %v174_v32 = vld [vmem:[#allocation8 + $0x130] sm:$0xff] }
  0x3c   : > { %v136_v62 = vld [vmem:[#allocation8] sm:$0xff]  ;;  %v137_v63 = vld [vmem:[#allocation8 + $0x8] sm:$0xff]  ;;  %288 = vmatpush.msra.mxu0 %v140_v58  ;;  %328 = vmatpush.msra.mxu2 %v141_v59  ;;  %v167_v33 = vld [vmem:[#allocation8 + $0xf8] sm:$0xff] }
  0x3d   : > { %308 = vmatpush.msra.mxu1 %v204_v60  ;;  %348 = vmatpush.msra.mxu3 %v205_v61  ;;  %v200_v4 = vld [vmem:[#allocation8 + $0x200] sm:$0xff]  ;;  %v201_v5 = vld [vmem:[#allocation8 + $0x208] sm:$0xff]  ;;  %v238_v34 = vld [vmem:[#allocation8 + $0x330] sm:$0xff] }
  0x3e   : > { %289 = vmatpush.msra.mxu0 %v136_v62  ;;  %329 = vmatpush.msra.mxu2 %v137_v63  ;;  %v235_v35 = vld [vmem:[#allocation8 + $0x318] sm:$0xff]  ;;  %v170_v36 = vld [vmem:[#allocation8 + $0x110] sm:$0xff] }
  0x3f   : > { %290 = vmatmul.f32.vlgmr.msra.gmra.mxu0 %v1350_v2  ;;  %330 = vmatmul.f32.vlgmr.msra.gmra.mxu2 %v1350_v2  ;;  %v163_v37 = vld [vmem:[#allocation8 + $0xd8] sm:$0xff]  ;;  %v234_v38 = vld [vmem:[#allocation8 + $0x310] sm:$0xff] }
  0x40   : > { %394 = vmatpush.msrb.mxu2 %v199_v3  ;;  %309 = vmatpush.msra.mxu1 %v200_v4  ;;  %v231_v39 = vld [vmem:[#allocation8 + $0x2f8] sm:$0xff]  ;;  %v166_v40 = vld [vmem:[#allocation8 + $0xf0] sm:$0xff] }
  0x41   : > { %349 = vmatpush.msra.mxu3 %v201_v5  ;;  %310 = vmatmul.f32.vlgmr.msra.gmra.mxu1 %v1243_v0  ;;  %v159_v41 = vld [vmem:[#allocation8 + $0xb8] sm:$0xff]  ;;  %v230_v42 = vld [vmem:[#allocation8 + $0x2f0] sm:$0xff] }
  0x42   : > { %350 = vmatmul.f32.vlgmr.msra.gmra.mxu3 %v1243_v0  ;;  %395 = vmatpush.msrb.mxu2 %v195_v6  ;;  %v227_v43 = vld [vmem:[#allocation8 + $0x2d8] sm:$0xff]  ;;  %v162_v44 = vld [vmem:[#allocation8 + $0xd0] sm:$0xff] }
  0x43   : > { %414 = vmatpush.msrb.mxu3 %v263_v7  ;;  %354 = vmatpush.msrb.mxu0 %v198_v8  ;;  %v155_v45 = vld [vmem:[#allocation8 + $0x98] sm:$0xff]  ;;  %v226_v46 = vld [vmem:[#allocation8 + $0x2d0] sm:$0xff]  ;;  %v539_v8 = vld [vmem:[#allocation11 + $0x1e0] sm:$0xff] }
  0x44   : > { %396 = vmatpush.msrb.mxu2 %v191_v9  ;;  %374 = vmatpush.msrb.mxu1 %v262_v10  ;;  %v223_v47 = vld [vmem:[#allocation8 + $0x2b8] sm:$0xff]  ;;  %v158_v48 = vld [vmem:[#allocation8 + $0xb0] sm:$0xff]  ;;  %v535_v10 = vld [vmem:[#allocation11 + $0x1c0] sm:$0xff] }
  0x45   : > { %415 = vmatpush.msrb.mxu3 %v259_v11  ;;  %355 = vmatpush.msrb.mxu0 %v194_v12  ;;  %v151_v49 = vld [vmem:[#allocation8 + $0x78] sm:$0xff]  ;;  %v222_v50 = vld [vmem:[#allocation8 + $0x2b0] sm:$0xff]  ;;  %v603_v11 = vld [vmem:[#allocation11 + $0x3e0] sm:$0xff] }
  0x46   : > { %397 = vmatpush.msrb.mxu2 %v187_v13  ;;  %375 = vmatpush.msrb.mxu1 %v258_v14  ;;  %v219_v51 = vld [vmem:[#allocation8 + $0x298] sm:$0xff]  ;;  %v154_v52 = vld [vmem:[#allocation8 + $0x90] sm:$0xff]  ;;  %v531_v14 = vld [vmem:[#allocation11 + $0x1a0] sm:$0xff] }
  0x47   : > { %416 = vmatpush.msrb.mxu3 %v255_v15  ;;  %356 = vmatpush.msrb.mxu0 %v190_v16  ;;  %v147_v53 = vld [vmem:[#allocation8 + $0x58] sm:$0xff]  ;;  %v218_v54 = vld [vmem:[#allocation8 + $0x290] sm:$0xff]  ;;  %v599_v15 = vld [vmem:[#allocation11 + $0x3c0] sm:$0xff] }
  0x48   : > { %398 = vmatpush.msrb.mxu2 %v183_v17  ;;  %376 = vmatpush.msrb.mxu1 %v254_v18  ;;  %v215_v55 = vld [vmem:[#allocation8 + $0x278] sm:$0xff]  ;;  %v150_v56 = vld [vmem:[#allocation8 + $0x70] sm:$0xff]  ;;  %v527_v17 = vld [vmem:[#allocation11 + $0x180] sm:$0xff] }
  0x49   : > { %417 = vmatpush.msrb.mxu3 %v251_v19  ;;  %357 = vmatpush.msrb.mxu0 %v186_v20  ;;  %v143_v57 = vld [vmem:[#allocation8 + $0x38] sm:$0xff]  ;;  %v214_v58 = vld [vmem:[#allocation8 + $0x270] sm:$0xff]  ;;  %v595_v18 = vld [vmem:[#allocation11 + $0x3a0] sm:$0xff] }
  0x4a   : > { %399 = vmatpush.msrb.mxu2 %v179_v21  ;;  %377 = vmatpush.msrb.mxu1 %v250_v22  ;;  %v211_v59 = vld [vmem:[#allocation8 + $0x258] sm:$0xff]  ;;  %v146_v60 = vld [vmem:[#allocation8 + $0x50] sm:$0xff]  ;;  %v523_v21 = vld [vmem:[#allocation11 + $0x160] sm:$0xff] }
  0x4b   : > { %418 = vmatpush.msrb.mxu3 %v247_v23  ;;  %358 = vmatpush.msrb.mxu0 %v182_v24  ;;  %v139_v61 = vld [vmem:[#allocation8 + $0x18] sm:$0xff]  ;;  %v210_v62 = vld [vmem:[#allocation8 + $0x250] sm:$0xff]  ;;  %v591_v22 = vld [vmem:[#allocation11 + $0x380] sm:$0xff] }
  0x4c   : > { %400 = vmatpush.msrb.mxu2 %v175_v25  ;;  %378 = vmatpush.msrb.mxu1 %v246_v26  ;;  %v207_v63 = vld [vmem:[#allocation8 + $0x238] sm:$0xff]  ;;  %v142_v3 = vld [vmem:[#allocation8 + $0x30] sm:$0xff]  ;;  %v519_v25 = vld [vmem:[#allocation11 + $0x140] sm:$0xff] }
  0x4d   : > { %419 = vmatpush.msrb.mxu3 %v243_v27  ;;  %359 = vmatpush.msrb.mxu0 %v178_v28  ;;  %v206_v4 = vld [vmem:[#allocation8 + $0x230] sm:$0xff]  ;;  %v203_v5 = vld [vmem:[#allocation8 + $0x218] sm:$0xff]  ;;  %v587_v26 = vld [vmem:[#allocation11 + $0x360] sm:$0xff] }
  0x4e   : > { %401 = vmatpush.msrb.mxu2 %v171_v29  ;;  %379 = vmatpush.msrb.mxu1 %v242_v30  ;;  %v138_v6 = vld [vmem:[#allocation8 + $0x10] sm:$0xff]  ;;  %v515_v29 = vld [vmem:[#allocation11 + $0x120] sm:$0xff] }
  0x4f   : > { %420 = vmatpush.msrb.mxu3 %v239_v31  ;;  %360 = vmatpush.msrb.mxu0 %v174_v32  ;;  %v202_v7 = vld [vmem:[#allocation8 + $0x210] sm:$0xff]  ;;  %v583_v30 = vld [vmem:[#allocation11 + $0x340] sm:$0xff] }
  0x50   : > { %402 = vmatpush.msrb.mxu2 %v167_v33  ;;  %380 = vmatpush.msrb.mxu1 %v238_v34  ;;  %v540_v9 = vld [vmem:[#allocation11 + $0x1e8] sm:$0xff]  ;;  %v511_v33 = vld [vmem:[#allocation11 + $0x100] sm:$0xff] }
  0x51   : > { %421 = vmatpush.msrb.mxu3 %v235_v35  ;;  %361 = vmatpush.msrb.mxu0 %v170_v36  ;;  %v536_v12 = vld [vmem:[#allocation11 + $0x1c8] sm:$0xff]  ;;  %v579_v34 = vld [vmem:[#allocation11 + $0x320] sm:$0xff] }
  0x52   : > { %403 = vmatpush.msrb.mxu2 %v163_v37  ;;  %381 = vmatpush.msrb.mxu1 %v234_v38  ;;  %v604_v13 = vld [vmem:[#allocation11 + $0x3e8] sm:$0xff]  ;;  %v507_v37 = vld [vmem:[#allocation11 + $0xe0] sm:$0xff] }
  0x53   : > { %422 = vmatpush.msrb.mxu3 %v231_v39  ;;  %362 = vmatpush.msrb.mxu0 %v166_v40  ;;  %v532_v16 = vld [vmem:[#allocation11 + $0x1a8] sm:$0xff]  ;;  %v575_v38 = vld [vmem:[#allocation11 + $0x300] sm:$0xff] }
  0x54   : > { %404 = vmatpush.msrb.mxu2 %v159_v41  ;;  %382 = vmatpush.msrb.mxu1 %v230_v42  ;;  %v528_v19 = vld [vmem:[#allocation11 + $0x188] sm:$0xff]  ;;  %v503_v41 = vld [vmem:[#allocation11 + $0xc0] sm:$0xff] }
  0x55   : > { %423 = vmatpush.msrb.mxu3 %v227_v43  ;;  %363 = vmatpush.msrb.mxu0 %v162_v44  ;;  %v596_v20 = vld [vmem:[#allocation11 + $0x3a8] sm:$0xff]  ;;  %v571_v42 = vld [vmem:[#allocation11 + $0x2e0] sm:$0xff] }
  0x56   : > { %405 = vmatpush.msrb.mxu2 %v155_v45  ;;  %383 = vmatpush.msrb.mxu1 %v226_v46  ;;  %v524_v23 = vld [vmem:[#allocation11 + $0x168] sm:$0xff]  ;;  %v499_v45 = vld [vmem:[#allocation11 + $0xa0] sm:$0xff] }
  0x57   : > { %424 = vmatpush.msrb.mxu3 %v223_v47  ;;  %364 = vmatpush.msrb.mxu0 %v158_v48  ;;  %v592_v24 = vld [vmem:[#allocation11 + $0x388] sm:$0xff]  ;;  %v567_v46 = vld [vmem:[#allocation11 + $0x2c0] sm:$0xff]  ;;  %v1360_v48 = vld [vmem:[#allocation9] sm:$0xf] }
  0x58   : > { %406 = vmatpush.msrb.mxu2 %v151_v49  ;;  %384 = vmatpush.msrb.mxu1 %v222_v50  ;;  %v520_v27 = vld [vmem:[#allocation11 + $0x148] sm:$0xff]  ;;  %v495_v50 = vld [vmem:[#allocation11 + $0x80] sm:$0xff] }
  0x59   : > { %425 = vmatpush.msrb.mxu3 %v219_v51  ;;  %365 = vmatpush.msrb.mxu0 %v154_v52  ;;  %v588_v28 = vld [vmem:[#allocation11 + $0x368] sm:$0xff]  ;;  %v563_v51 = vld [vmem:[#allocation11 + $0x2a0] sm:$0xff] }
  0x5a   : > { %407 = vmatpush.msrb.mxu2 %v147_v53  ;;  %385 = vmatpush.msrb.mxu1 %v218_v54  ;;  %v516_v31 = vld [vmem:[#allocation11 + $0x128] sm:$0xff]  ;;  %v491_v54 = vld [vmem:[#allocation11 + $0x60] sm:$0xff] }
  0x5b   : > { %426 = vmatpush.msrb.mxu3 %v215_v55  ;;  %366 = vmatpush.msrb.mxu0 %v150_v56  ;;  %v584_v32 = vld [vmem:[#allocation11 + $0x348] sm:$0xff]  ;;  %v559_v55 = vld [vmem:[#allocation11 + $0x280] sm:$0xff] }
  0x5c   : > { %408 = vmatpush.msrb.mxu2 %v143_v57  ;;  %386 = vmatpush.msrb.mxu1 %v214_v58  ;;  %v512_v35 = vld [vmem:[#allocation11 + $0x108] sm:$0xff]  ;;  %v266_v57 = vperm.slane %v1360_v48, 0 }
  0x5d   : > { %427 = vmatpush.msrb.mxu3 %v211_v59  ;;  %367 = vmatpush.msrb.mxu0 %v146_v60  ;;  %v580_v36 = vld [vmem:[#allocation11 + $0x328] sm:$0xff]  ;;  %v487_v59 = vld [vmem:[#allocation11 + $0x40] sm:$0xff] }
  0x5e   : > { %409 = vmatpush.msrb.mxu2 %v139_v61  ;;  %387 = vmatpush.msrb.mxu1 %v210_v62  ;;  %v508_v39 = vld [vmem:[#allocation11 + $0xe8] sm:$0xff]  ;;  %v555_v60 = vld [vmem:[#allocation11 + $0x260] sm:$0xff] }
  0x5f   : > { %428 = vmatpush.msrb.mxu3 %v207_v63  ;;  %410 = vmatmul.f32.vlgmr.msrb.gmra.mxu2 %v1350_v2  ;;  %v576_v40 = vld [vmem:[#allocation11 + $0x308] sm:$0xff] }
  0x60   : > { %368 = vmatpush.msrb.mxu0 %v142_v3  ;;  %388 = vmatpush.msrb.mxu1 %v206_v4  ;;  %v504_v43 = vld [vmem:[#allocation11 + $0xc8] sm:$0xff]  ;;  %v483_v3 = vld [vmem:[#allocation11 + $0x20] sm:$0xff] }
  0x61   : > { %429 = vmatpush.msrb.mxu3 %v203_v5  ;;  %657 = vmatpush.msra.mxu2 %v540_v9  ;;  %v572_v44 = vld [vmem:[#allocation11 + $0x2e8] sm:$0xff]  ;;  %v551_v4 = vld [vmem:[#allocation11 + $0x240] sm:$0xff] }
  0x62   : > { %430 = vmatmul.f32.vlgmr.msrb.gmra.mxu3 %v1243_v0  ;;  %369 = vmatpush.msrb.mxu0 %v138_v6  ;;  %v500_v47 = vld [vmem:[#allocation11 + $0xa8] sm:$0xff]  ;;  %v479_v9 = vld [vmem:[#allocation11] sm:$0xff] }
  0x63   : > { %370 = vmatmul.f32.vlgmr.msrb.gmra.mxu0 %v1350_v2  ;;  %389 = vmatpush.msrb.mxu1 %v202_v7  ;;  %v600_v2 = vld [vmem:[#allocation11 + $0x3c8] sm:$0xff] }
  0x64   : > { %390 = vmatmul.f32.vlgmr.msrb.gmra.mxu1 %v1243_v0  ;;  %617 = vmatpush.msra.mxu0 %v539_v8  ;;  %v568_v49 = vld [vmem:[#allocation11 + $0x2c8] sm:$0xff] }
  0x65   : > { %637 = vmatpush.msra.mxu1 %v603_v11  ;;  %658 = vmatpush.msra.mxu2 %v536_v12  ;;  %v496_v52 = vld [vmem:[#allocation11 + $0x88] sm:$0xff] }
  0x66   : > { %618 = vmatpush.msra.mxu0 %v535_v10  ;;  %677 = vmatpush.msra.mxu3 %v604_v13  ;;  %v564_v53 = vld [vmem:[#allocation11 + $0x2a8] sm:$0xff]  ;;  %v547_v10 = vld [vmem:[#allocation11 + $0x220] sm:$0xff]  ;;  %v267_v13 = vperm.slane %v1360_v48, 1 }
  0x67   : > { %638 = vmatpush.msra.mxu1 %v599_v15  ;;  %659 = vmatpush.msra.mxu2 %v532_v16  ;;  %v492_v56 = vld [vmem:[#allocation11 + $0x68] sm:$0xff]  ;;  %v541_v15 = vld [vmem:[#allocation11 + $0x1f0] sm:$0xff]  ;;  %v542_v16 = vld [vmem:[#allocation11 + $0x1f8] sm:$0xff] }
  0x68   : > { %619 = vmatpush.msra.mxu0 %v531_v14  ;;  %678 = vmatpush.msra.mxu3 %v600_v2  ;;  %v560_v58 = vld [vmem:[#allocation11 + $0x288] sm:$0xff]  ;;  %v543_v2 = vld [vmem:[#allocation11 + $0x200] sm:$0xff] }
  0x69   : > { %639 = vmatpush.msra.mxu1 %v595_v18  ;;  %660 = vmatpush.msra.mxu2 %v528_v19  ;;  %v488_v61 = vld [vmem:[#allocation11 + $0x48] sm:$0xff]  ;;  %v537_v18 = vld [vmem:[#allocation11 + $0x1d0] sm:$0xff] }
  0x6a   : > { %620 = vmatpush.msra.mxu0 %v527_v17  ;;  %679 = vmatpush.msra.mxu3 %v596_v20  ;;  %v556_v62 = vld [vmem:[#allocation11 + $0x268] sm:$0xff]  ;;  %v605_v20 = vld [vmem:[#allocation11 + $0x3f0] sm:$0xff] }
  0x6b   : > { %640 = vmatpush.msra.mxu1 %v591_v22  ;;  %661 = vmatpush.msra.mxu2 %v524_v23  ;;  %v484_v5 = vld [vmem:[#allocation11 + $0x28] sm:$0xff]  ;;  %v606_v22 = vld [vmem:[#allocation11 + $0x3f8] sm:$0xff] }
  0x6c   : > { %621 = vmatpush.msra.mxu0 %v523_v21  ;;  %680 = vmatpush.msra.mxu3 %v592_v24  ;;  %v552_v7 = vld [vmem:[#allocation11 + $0x248] sm:$0xff]  ;;  %v538_v21 = vld [vmem:[#allocation11 + $0x1d8] sm:$0xff] }
  0x6d   : > { %641 = vmatpush.msra.mxu1 %v587_v26  ;;  %662 = vmatpush.msra.mxu2 %v520_v27  ;;  %v480_v11 = vld [vmem:[#allocation11 + $0x8] sm:$0xff]  ;;  %v601_v26 = vld [vmem:[#allocation11 + $0x3d0] sm:$0xff]  ;;  %v534_v27 = vld [vmem:[#allocation11 + $0x1b8] sm:$0xff] }
  0x6e   : > { %622 = vmatpush.msra.mxu0 %v519_v25  ;;  %681 = vmatpush.msra.mxu3 %v588_v28  ;;  %v548_v14 = vld [vmem:[#allocation11 + $0x228] sm:$0xff]  ;;  %v533_v25 = vld [vmem:[#allocation11 + $0x1b0] sm:$0xff]  ;;  %v602_v28 = vld [vmem:[#allocation11 + $0x3d8] sm:$0xff] }
  0x6f   : > { %642 = vmatpush.msra.mxu1 %v583_v30  ;;  %663 = vmatpush.msra.mxu2 %v516_v31  ;;  %v544_v17 = vld [vmem:[#allocation11 + $0x208] sm:$0xff]  ;;  %v529_v30 = vld [vmem:[#allocation11 + $0x190] sm:$0xff] }
  0x70   : > { %623 = vmatpush.msra.mxu0 %v515_v29  ;;  %682 = vmatpush.msra.mxu3 %v584_v32  ;;  %v597_v31 = vld [vmem:[#allocation11 + $0x3b0] sm:$0xff]  ;;  %v530_v32 = vld [vmem:[#allocation11 + $0x198] sm:$0xff] }
  0x71   : > { %643 = vmatpush.msra.mxu1 %v579_v34  ;;  %664 = vmatpush.msra.mxu2 %v512_v35  ;;  %v598_v34 = vld [vmem:[#allocation11 + $0x3b8] sm:$0xff]  ;;  %v525_v35 = vld [vmem:[#allocation11 + $0x170] sm:$0xff] }
  0x72   : > { %624 = vmatpush.msra.mxu0 %v511_v33  ;;  %683 = vmatpush.msra.mxu3 %v580_v36  ;;  %v593_v36 = vld [vmem:[#allocation11 + $0x390] sm:$0xff] }
  0x73   : > { %644 = vmatpush.msra.mxu1 %v575_v38  ;;  %665 = vmatpush.msra.mxu2 %v508_v39  ;;  %v594_v39 = vld [vmem:[#allocation11 + $0x398] sm:$0xff] }
  0x74   : > { %625 = vmatpush.msra.mxu0 %v507_v37  ;;  %684 = vmatpush.msra.mxu3 %v576_v40  ;;  %v526_v37 = vld [vmem:[#allocation11 + $0x178] sm:$0xff] }
  0x75   : > { %645 = vmatpush.msra.mxu1 %v571_v42  ;;  %666 = vmatpush.msra.mxu2 %v504_v43  ;;  %v589_v42 = vld [vmem:[#allocation11 + $0x370] sm:$0xff]  ;;  %v522_v43 = vld [vmem:[#allocation11 + $0x158] sm:$0xff] }
  0x76   : > { %626 = vmatpush.msra.mxu0 %v503_v41  ;;  %685 = vmatpush.msra.mxu3 %v572_v44  ;;  %v521_v41 = vld [vmem:[#allocation11 + $0x150] sm:$0xff] }
  0x77   : > { %646 = vmatpush.msra.mxu1 %v567_v46  ;;  %667 = vmatpush.msra.mxu2 %v500_v47  ;;  %v517_v46 = vld [vmem:[#allocation11 + $0x130] sm:$0xff] }
  0x78   : > { %627 = vmatpush.msra.mxu0 %v499_v45  ;;  %686 = vmatpush.msra.mxu3 %v568_v49  ;;  %v590_v45 = vld [vmem:[#allocation11 + $0x378] sm:$0xff]  ;;  %v585_v47 = vld [vmem:[#allocation11 + $0x350] sm:$0xff] }
  0x79   : > { %647 = vmatpush.msra.mxu1 %v563_v51  ;;  %668 = vmatpush.msra.mxu2 %v496_v52  ;;  %v518_v49 = vld [vmem:[#allocation11 + $0x138] sm:$0xff]  ;;  %v513_v51 = vld [vmem:[#allocation11 + $0x110] sm:$0xff] }
  0x7a   : > { %628 = vmatpush.msra.mxu0 %v495_v50  ;;  %687 = vmatpush.msra.mxu3 %v564_v53  ;;  %v586_v50 = vld [vmem:[#allocation11 + $0x358] sm:$0xff]  ;;  %v581_v52 = vld [vmem:[#allocation11 + $0x330] sm:$0xff] }
  0x7b   : > { %648 = vmatpush.msra.mxu1 %v559_v55  ;;  %669 = vmatpush.msra.mxu2 %v492_v56  ;;  %v514_v53 = vld [vmem:[#allocation11 + $0x118] sm:$0xff]  ;;  %v509_v55 = vld [vmem:[#allocation11 + $0xf0] sm:$0xff] }
  0x7c   : > { %629 = vmatpush.msra.mxu0 %v491_v54  ;;  %688 = vmatpush.msra.mxu3 %v560_v58  ;;  %v582_v54 = vld [vmem:[#allocation11 + $0x338] sm:$0xff]  ;;  %v577_v56 = vld [vmem:[#allocation11 + $0x310] sm:$0xff] }
  0x7d   : > { %649 = vmatpush.msra.mxu1 %v555_v60  ;;  %670 = vmatpush.msra.mxu2 %v488_v61  ;;  %v578_v58 = vld [vmem:[#allocation11 + $0x318] sm:$0xff]  ;;  %v505_v60 = vld [vmem:[#allocation11 + $0xd0] sm:$0xff] }
  0x7e   : > { %630 = vmatpush.msra.mxu0 %v487_v59  ;;  %689 = vmatpush.msra.mxu3 %v556_v62  ;;  %v573_v61 = vld [vmem:[#allocation11 + $0x2f0] sm:$0xff] }
  0x7f   : > { %650 = vmatpush.msra.mxu1 %v551_v4  ;;  %671 = vmatpush.msra.mxu2 %v484_v5  ;;  %v501_v5 = vld [vmem:[#allocation11 + $0xb0] sm:$0xff] }
  0x80   : > { %631 = vmatpush.msra.mxu0 %v483_v3  ;;  %690 = vmatpush.msra.mxu3 %v552_v7  ;;  %v574_v3 = vld [vmem:[#allocation11 + $0x2f8] sm:$0xff] }
  0x81   : > { %651 = vmatpush.msra.mxu1 %v547_v10  ;;  %672 = vmatpush.msra.mxu2 %v480_v11  ;;  %v502_v7 = vld [vmem:[#allocation11 + $0xb8] sm:$0xff]  ;;  %v497_v10 = vld [vmem:[#allocation11 + $0x90] sm:$0xff] }
  0x82   : > { %632 = vmatpush.msra.mxu0 %v479_v9  ;;  %691 = vmatpush.msra.mxu3 %v548_v14  ;;  %v565_v11 = vld [vmem:[#allocation11 + $0x2b0] sm:$0xff] }
  0x83   : > { %737 = vmatpush.msrb.mxu2 %v542_v16  ;;  %652 = vmatpush.msra.mxu1 %v543_v2  ;;  %v493_v14 = vld [vmem:[#allocation11 + $0x70] sm:$0xff]  ;;  %v494_v16 = vld [vmem:[#allocation11 + $0x78] sm:$0xff] }
  0x84   : > { %697 = vmatpush.msrb.mxu0 %v541_v15  ;;  %692 = vmatpush.msra.mxu3 %v544_v17  ;;  %v561_v15 = vld [vmem:[#allocation11 + $0x290] sm:$0xff]  ;;  %v562_v17 = vld [vmem:[#allocation11 + $0x298] sm:$0xff] }
  0x85   : > { %717 = vmatpush.msrb.mxu1 %v605_v20  ;;  %738 = vmatpush.msrb.mxu2 %v538_v21  ;;  %v557_v20 = vld [vmem:[#allocation11 + $0x270] sm:$0xff]  ;;  %v490_v21 = vld [vmem:[#allocation11 + $0x58] sm:$0xff] }
  0x86   : > { %698 = vmatpush.msrb.mxu0 %v537_v18  ;;  %757 = vmatpush.msrb.mxu3 %v606_v22  ;;  %v558_v22 = vld [vmem:[#allocation11 + $0x278] sm:$0xff] }
  0x87   : > { %718 = vmatpush.msrb.mxu1 %v601_v26  ;;  %739 = vmatpush.msrb.mxu2 %v534_v27  ;;  %v486_v27 = vld [vmem:[#allocation11 + $0x38] sm:$0xff] }
  0x88   : > { %699 = vmatpush.msrb.mxu0 %v533_v25  ;;  %758 = vmatpush.msrb.mxu3 %v602_v28  ;;  %v553_v25 = vld [vmem:[#allocation11 + $0x250] sm:$0xff]  ;;  %v554_v28 = vld [vmem:[#allocation11 + $0x258] sm:$0xff] }
  0x89   : > { %719 = vmatpush.msrb.mxu1 %v597_v31  ;;  %740 = vmatpush.msrb.mxu2 %v530_v32  ;;  %v268_v31 = vperm.slane %v1360_v48, 2  ;;  %v482_v32 = vld [vmem:[#allocation11 + $0x18] sm:$0xff] }
  0x8a   : > { %700 = vmatpush.msrb.mxu0 %v529_v30  ;;  %759 = vmatpush.msrb.mxu3 %v598_v34  ;;  %v549_v30 = vld [vmem:[#allocation11 + $0x230] sm:$0xff] }
  0x8b   : > { %720 = vmatpush.msrb.mxu1 %v593_v36  ;;  %741 = vmatpush.msrb.mxu2 %v526_v37  ;;  %v545_v36 = vld [vmem:[#allocation11 + $0x210] sm:$0xff] }
  0x8c   : > { %701 = vmatpush.msrb.mxu0 %v525_v35  ;;  %760 = vmatpush.msrb.mxu3 %v594_v39  ;;  %v269_v35 = vperm.slane %v1360_v48, 3  ;;  %v546_v39 = vld [vmem:[#allocation11 + $0x218] sm:$0xff] }
  0x8d   : > { %721 = vmatpush.msrb.mxu1 %v589_v42  ;;  %742 = vmatpush.msrb.mxu2 %v522_v43 }
  0x8e   : > { %702 = vmatpush.msrb.mxu0 %v521_v41  ;;  %761 = vmatpush.msrb.mxu3 %v590_v45 }
  0x8f   : > { %722 = vmatpush.msrb.mxu1 %v585_v47  ;;  %743 = vmatpush.msrb.mxu2 %v518_v49 }
  0x90   : > { %703 = vmatpush.msrb.mxu0 %v517_v46  ;;  %762 = vmatpush.msrb.mxu3 %v586_v50 }
  0x91   : > { %723 = vmatpush.msrb.mxu1 %v581_v52  ;;  %744 = vmatpush.msrb.mxu2 %v514_v53 }
  0x92   : > { %704 = vmatpush.msrb.mxu0 %v513_v51  ;;  %763 = vmatpush.msrb.mxu3 %v582_v54 }
  0x93   : > { %724 = vmatpush.msrb.mxu1 %v577_v56  ;;  %693 = vmatmul.f32.vlgmr.msra.gmra.mxu3 %v1239_v1 }
  0x94   : > { %705 = vmatpush.msrb.mxu0 %v509_v55  ;;  %764 = vmatpush.msrb.mxu3 %v578_v58 }
  0x95   : > { %725 = vmatpush.msrb.mxu1 %v573_v61 }
  0x96   : > { %706 = vmatpush.msrb.mxu0 %v505_v60  ;;  %765 = vmatpush.msrb.mxu3 %v574_v3 }
  0x97   : > { %653 = vmatmul.f32.vlgmr.msra.gmra.mxu1 %v1239_v1 }
  0x98   : > { %707 = vmatpush.msrb.mxu0 %v501_v5 }
  0x9a   : > { %708 = vmatpush.msrb.mxu0 %v497_v10 }
  0x9c   : > { %709 = vmatpush.msrb.mxu0 %v493_v14 }
  0xbc   : > { %v291_v63 = vpop.f32.mrf.mxu0 }
  0xbd   : > { %v292_v6 = vadd.f32 %v291_v63, %v266_v57  ;;  %v510_v57 = vld [vmem:[#allocation11 + $0xf8] sm:$0xff] }
  0xbe   : > { %v311_v8 = vpop.f32.mrf.mxu1  ;;  %v506_v63 = vld [vmem:[#allocation11 + $0xd8] sm:$0xff]  ;;  %745 = vmatpush.msrb.mxu2 %v510_v57 }
  0xbf   : > { %v312_v12 = vadd.f32 %v311_v8, %v292_v6  ;;  %v569_v6 = vld [vmem:[#allocation11 + $0x2d0] sm:$0xff]  ;;  %v570_v8 = vld [vmem:[#allocation11 + $0x2d8] sm:$0xff] }
  0xc0   : > { %746 = vmatpush.msrb.mxu2 %v506_v63  ;;  %726 = vmatpush.msrb.mxu1 %v569_v6 }
  0xc1   : > { %v939_v19 = vmul.f32 -1.442695, %v312_v12  ;;  %v498_v12 = vld [vmem:[#allocation11 + $0x98] sm:$0xff]  ;;  %766 = vmatpush.msrb.mxu3 %v570_v8 }
  0xc2   : > { %v331_v23 = vpop.f32.mrf.mxu2  ;;  %747 = vmatpush.msrb.mxu2 %v502_v7  ;;  %727 = vmatpush.msrb.mxu1 %v565_v11 }
  0xc3   : > { %1026 = vpow2.f32 %v939_v19  ;;  %v332_v24 = vadd.f32 %v331_v23, %v267_v13  ;;  %v566_v13 = vld [vmem:[#allocation11 + $0x2b8] sm:$0xff]  ;;  %v489_v19 = vld [vmem:[#allocation11 + $0x50] sm:$0xff] }
  0xc4   : > { %748 = vmatpush.msrb.mxu2 %v498_v12  ;;  %767 = vmatpush.msrb.mxu3 %v566_v13 }
  0xc5   : > { %v351_v29 = vpop.f32.mrf.mxu3  ;;  %728 = vmatpush.msrb.mxu1 %v561_v15  ;;  %710 = vmatpush.msrb.mxu0 %v489_v19 }
  0xc6   : > { %v352_v33 = vadd.f32 %v351_v29, %v332_v24  ;;  %749 = vmatpush.msrb.mxu2 %v494_v16  ;;  %768 = vmatpush.msrb.mxu3 %v562_v17  ;;  %v485_v24 = vld [vmem:[#allocation11 + $0x30] sm:$0xff] }
  0xc7   : > { %729 = vmatpush.msrb.mxu1 %v557_v20  ;;  %v481_v29 = vld [vmem:[#allocation11 + $0x10] sm:$0xff]  ;;  %711 = vmatpush.msrb.mxu0 %v485_v24 }
  0xc8   : > { %v940_v38 = vmul.f32 -1.442695, %v352_v33  ;;  %750 = vmatpush.msrb.mxu2 %v490_v21  ;;  %769 = vmatpush.msrb.mxu3 %v558_v22  ;;  %v550_v33 = vld [vmem:[#allocation11 + $0x238] sm:$0xff] }
  0xc9   : > { %v1027_v40 = vpop.eup %1026  ;;  %730 = vmatpush.msrb.mxu1 %v553_v25  ;;  %712 = vmatpush.msrb.mxu0 %v481_v29 }
  0xca   : > { %v1364_v44 = vadd.f32 1.0, %v1027_v40  ;;  %1028 = vpow2.f32 %v940_v38  ;;  %751 = vmatpush.msrb.mxu2 %v486_v27  ;;  %770 = vmatpush.msrb.mxu3 %v554_v28 }
  0xcb   : > { %731 = vmatpush.msrb.mxu1 %v549_v30 }
  0xcc   : > { %1030 = vrcp.f32 %v1364_v44  ;;  %vm443_vm0 = vweird.f32 %v1364_v44  ;;  %v449_v40 = vand.u32 2147483648, %v1364_v44  ;;  %752 = vmatpush.msrb.mxu2 %v482_v32  ;;  %771 = vmatpush.msrb.mxu3 %v550_v33  ;;  %v447_v48 = vand.u32 2147483647, %v1364_v44 }
  0xcd   : > { %732 = vmatpush.msrb.mxu1 %v545_v36 }
  0xce   : > { %772 = vmatpush.msrb.mxu3 %v546_v39  ;;  %733 = vmatmul.f32.vlgmr.msrb.gmra.mxu1 %v1239_v1  ;;  %v450_v50 = vor.u32 1.1754944e-38, %v449_v40  ;;  %vm448_vm5 = vcmp.eq.f32.partialorder %v447_v48, 8.507059e+37 }
  0xcf   : > { %773 = vmatmul.f32.vlgmr.msrb.gmra.mxu3 %v1239_v1 }
  0xd0   : > { %v1029_v59 = vpop.eup %1028 }
  0xd1   : > { %v1367_v62 = vadd.f32 1.0, %v1029_v59 }
  0xd2   : > { %v1369_v4 = vpop.eup %1030 }
  0xd3   : > { %1032 = vrcp.f32 %v1367_v62  ;;  %v439_v9 = vmul.f32 %v1369_v4, %v1364_v44  ;;  %vm444_vm1 = vweird.f32 %v1369_v4  ;;  %vm462_vm3 = vweird.f32 %v1367_v62 }
  0xd4   : > { %vm445_vm2 = vmor %vm443_vm0, %vm444_vm1  ;;  %v468_v52 = vand.u32 2147483648, %v1367_v62  ;;  %v466_v55 = vand.u32 2147483647, %v1367_v62 }
  0xd5   : > { %v440_v2 = vsub.f32 1.0, %v439_v9 }
  0xd6   : > { %v469_v58 = vor.u32 1.1754944e-38, %v468_v52  ;;  %vm467_vm7 = vcmp.eq.f32.partialorder %v466_v55, 8.507059e+37 }
  0xd7   : > { %v441_v26 = vmul.f32 %v1369_v4, %v440_v2 }
  0xd9   : > { %v1374_v18 = vpop.eup %1032  ;;  %v442_v38 = vadd.f32 %v1369_v4, %v441_v26 }
  0xda   : > { %v458_v23 = vmul.f32 %v1374_v18, %v1367_v62  ;;  %vm463_vm4 = vweird.f32 %v1374_v18  ;;  %v607_v62 = vld [vmem:[%s1433_s5] sm:$0xf] }
  0xdb   : > { %v446_v47 = vsel %vm445_vm2, %v1369_v4, %v442_v38  ;;  %vm464_vm6 = vmor %vm462_vm3, %vm463_vm4  ;;  %v609_v5 = vperm.slane %v607_v62, 0  ;;  %v610_v10 = vperm.slane %v607_v62, 1  ;;  %v612_v21 = vperm.slane %v607_v62, 3 }
  0xdc   : > { %v459_v34 = vsub.f32 1.0, %v458_v23  ;;  %v451_v53 = vsel %vm448_vm5, %v450_v50, %v446_v47  ;;  %v611_v23 = vperm.slane %v607_v62, 2  ;;  %v836_v62 = vld [vmem:[#allocation12 + $0x20] sm:$0xff] (%p127_p0) }
  0xde   : > { %v460_v43 = vmul.f32 %v1374_v18, %v459_v34 }
  0xe0   : > { %v371_v37 = vpop.f32.mrf.mxu0  ;;  %v461_v54 = vadd.f32 %v1374_v18, %v460_v43 }
  0xe1   : > { %v372_v42 = vadd.f32 %v371_v37, %v268_v31  ;;  %v391_v46 = vpop.f32.mrf.mxu1 }
  0xe2   : > { %v411_v41 = vpop.f32.mrf.mxu2  ;;  %v465_v59 = vsel %vm464_vm6, %v1374_v18, %v461_v54 }
  0xe3   : > { %v412_v45 = vadd.f32 %v411_v41, %v269_v35  ;;  %v392_v51 = vadd.f32 %v391_v46, %v372_v42  ;;  %v470_v60 = vsel %vm467_vm7, %v469_v58, %v465_v59  ;;  %v845_v58 = vld [vmem:[#allocation12 + $0x68] sm:$0xff] (%p127_p0)  ;;  %v844_v59 = vld [vmem:[#allocation12 + $0x60] sm:$0xff] (%p127_p0) }
  0xe4   : > { %v475_v61 = vsub.f32 1.0, %v470_v60  ;;  %v477_v4 = vmul.f32 %v1243_v0, %v470_v60  ;;  %v843_v60 = vld [vmem:[#allocation12 + $0x58] sm:$0xff] (%p127_p0) }
  0xe5   : > { %v431_v49 = vpop.f32.mrf.mxu3 }
  0xe6   : > { %v432_v44 = vadd.f32 %v431_v49, %v412_v45 }
  0xe8   : > { %v472_v56 = vmul.f32 %v451_v53, %v432_v44 }
  0xea   : > { %v473_v57 = vadd.f32 %v472_v56, %v392_v51  ;;  %v847_v56 = vld [vmem:[#allocation12 + $0x78] sm:$0xff] (%p127_p0) }
  0xeb   :  { %945 = vmatpush.msra.mxu3 (%p127_p0), %v847_v56  ;;  %943 = vmatpush.msra.mxu1 (%p127_p0), %v847_v56 }
  0xec   : > { %1034 = vtanh.f32 %v473_v57  ;;  %v846_v57 = vld [vmem:[#allocation12 + $0x70] sm:$0xff] (%p127_p0) }
  0xed   :  { %948 = vmatpush.msra.mxu3 (%p127_p0), %v846_v57  ;;  %946 = vmatpush.msra.mxu1 (%p127_p0), %v846_v57 }
  0xef   :  { %951 = vmatpush.msra.mxu3 (%p127_p0), %v845_v58  ;;  %949 = vmatpush.msra.mxu1 (%p127_p0), %v845_v58 }
  0xf1   :  { %954 = vmatpush.msra.mxu3 (%p127_p0), %v844_v59  ;;  %952 = vmatpush.msra.mxu1 (%p127_p0), %v844_v59 }
  0xf2   : > { %v1035_v63 = vpop.eup %1034 }
  0xf3   : > { %v476_v3 = vmul.f32 %v1035_v63, %v475_v61  ;;  %957 = vmatpush.msra.mxu3 (%p127_p0), %v843_v60  ;;  %955 = vmatpush.msra.mxu1 (%p127_p0), %v843_v60  ;;  %v840_v61 = vld [vmem:[#allocation12 + $0x40] sm:$0xff] (%p127_p0)  ;;  %v839_v63 = vld [vmem:[#allocation12 + $0x38] sm:$0xff] (%p127_p0) }
  0xf5   : > { %v1399_v0 = vadd.f32 %v477_v4, %v476_v3   ;;  %v838_v3 = vld [vmem:[#allocation12 + $0x30] sm:$0xff] (%p127_p0)  ;;  %v837_v4 = vld [vmem:[#allocation12 + $0x28] sm:$0xff] (%p127_p0) }
  0xf7   : > { %633 = vmatmul.f32.vlgmr.msra.gmra.mxu0 %v1399_v0  ;;  %673 = vmatmul.f32.vlgmr.msra.gmra.mxu2 %v1399_v0 }
  0xf8   :  { %944 = vmatpush.msra.mxu2 (%p127_p0), %v847_v56  ;;  %852 = vmatpush.msra.mxu0 (%p127_p0), %v847_v56 }
  0xfa   :  { %947 = vmatpush.msra.mxu2 (%p127_p0), %v846_v57  ;;  %853 = vmatpush.msra.mxu0 (%p127_p0), %v846_v57 }
  0xfc   :  { %950 = vmatpush.msra.mxu2 (%p127_p0), %v845_v58  ;;  %854 = vmatpush.msra.mxu0 (%p127_p0), %v845_v58 }
  0xfe   :  { %953 = vmatpush.msra.mxu2 (%p127_p0), %v844_v59  ;;  %855 = vmatpush.msra.mxu0 (%p127_p0), %v844_v59 }
  0xff   : > { %713 = vmatmul.f32.vlgmr.msrb.gmra.mxu0 %v1399_v0  ;;  %753 = vmatmul.f32.vlgmr.msrb.gmra.mxu2 %v1399_v0  ;;  %v842_v0 = vld [vmem:[#allocation12 + $0x50] sm:$0xff] (%p127_p0) }
 0x100   :  { %956 = vmatpush.msra.mxu2 (%p127_p0), %v843_v60  ;;  %856 = vmatpush.msra.mxu0 (%p127_p0), %v843_v60 }
 0x101   :  { %960 = vmatpush.msra.mxu3 (%p127_p0), %v842_v0  ;;  %958 = vmatpush.msra.mxu1 (%p127_p0), %v842_v0 }
 0x102   :  { %959 = vmatpush.msra.mxu2 (%p127_p0), %v842_v0  ;;  %857 = vmatpush.msra.mxu0 (%p127_p0), %v842_v0 }
 0x114   : > { %v654_v7 = vpop.f32.mrf.mxu1 }
 0x116   : > { %v694_v13 = vpop.f32.mrf.mxu3 }
 0x14b   : > { %v734_v35 = vpop.f32.mrf.mxu1 }
 0x152   : > { %v774_v33 = vpop.f32.mrf.mxu3 }
 0x174   : > { %v634_v6 = vpop.f32.mrf.mxu0 }
 0x175   : > { %v635_v8 = vadd.f32 %v634_v6, %v609_v5  ;;  %v835_v5 = vld [vmem:[#allocation12 + $0x18] sm:$0xff] (%p127_p0)  ;;  %v834_v6 = vld [vmem:[#allocation12 + $0x10] sm:$0xff] (%p127_p0) }
 0x177   : > { %v655_v9 = vadd.f32 %v654_v7, %v635_v8  ;;  %v833_v7 = vld [vmem:[#allocation12 + $0x8] sm:$0xff] (%p127_p0)  ;;  %v832_v8 = vld [vmem:[#allocation12] sm:$0xff] (%p127_p0) }
 0x179   : > { %v941_v11 = vmul.f32 -1.442695, %v655_v9 }
 0x17a   : > { %v674_v12 = vpop.f32.mrf.mxu2 }
 0x17b   : > { %1036 = vpow2.f32 %v941_v11  ;;  %v675_v14 = vadd.f32 %v674_v12, %v610_v10 }
 0x17c   : > { %v714_v25 = vpop.f32.mrf.mxu0 }
 0x17d   : > { %v695_v15 = vadd.f32 %v694_v13, %v675_v14  ;;  %v715_v32 = vadd.f32 %v714_v25, %v611_v23 }
 0x17f   : > { %v942_v16 = vmul.f32 -1.442695, %v695_v15  ;;  %v735_v41 = vadd.f32 %v734_v35, %v715_v32 }
 0x181   : > { %v1037_v2 = vpop.eup %1036  ;;  %1038 = vpow2.f32 %v942_v16 }
 0x182   : > { %v780_v17 = vadd.f32 1.0, %v1037_v2  ;;  %v754_v24 = vpop.f32.mrf.mxu2  ;;  %v1046_v2 = vld [vmem:[%s1435_s7] ss:$0 sm:$0xff] (%p127_p0) }
 0x183   : > { %v755_v28 = vadd.f32 %v754_v24, %v612_v21 }
 0x184   : > { %1040 = vrcp.f32 %v780_v17  ;;  %v792_v27 = vand.u32 2147483648, %v780_v17  ;;  %v790_v30 = vand.u32 2147483647, %v780_v17  ;;  %vm786_vm9 = vweird.f32 %v780_v17 }
 0x185   : > { %v775_v39 = vadd.f32 %v774_v33, %v755_v28 }
 0x186   : > { %v793_v37 = vor.u32 1.1754944e-38, %v792_v27  ;;  %vm791_vm11 = vcmp.eq.f32.partialorder %v790_v30, 8.507059e+37 }
 0x187   : > { %v1039_v18 = vpop.eup %1038 }
 0x188   : > { %v799_v19 = vadd.f32 1.0, %v1039_v18 }
 0x18a   : > { %v1041_v20 = vpop.eup %1040  ;;  %1042 = vrcp.f32 %v799_v19  ;;  %v811_v43 = vand.u32 2147483648, %v799_v19  ;;  %v809_v46 = vand.u32 2147483647, %v799_v19  ;;  %vm805_vm13 = vweird.f32 %v799_v19 }
 0x18b   : > { %v782_v22 = vmul.f32 %v1041_v20, %v780_v17  ;;  %vm787_vm8 = vweird.f32 %v1041_v20 }
 0x18c   : > { %vm788_vm10 = vmor %vm786_vm9, %vm787_vm8  ;;  %v812_v50 = vor.u32 1.1754944e-38, %v811_v43  ;;  %vm810_vm15 = vcmp.eq.f32.partialorder %v809_v46, 8.507059e+37 }
 0x18d   : > { %v783_v26 = vsub.f32 1.0, %v782_v22 }
 0x18f   : > { %v784_v29 = vmul.f32 %v1041_v20, %v783_v26 }
 0x190   : > { %v1043_v31 = vpop.eup %1042 }
 0x191   : > { %v801_v34 = vmul.f32 %v1043_v31, %v799_v19  ;;  %v785_v36 = vadd.f32 %v1041_v20, %v784_v29  ;;  %vm806_vm12 = vweird.f32 %v1043_v31 }
 0x192   : > { %vm807_vm14 = vmor %vm805_vm13, %vm806_vm12 }
 0x193   : > { %v802_v38 = vsub.f32 1.0, %v801_v34  ;;  %v789_v40 = vsel %vm788_vm10, %v1041_v20, %v785_v36 }
 0x194   : > { %v794_v42 = vsel %vm791_vm11, %v793_v37, %v789_v40 }
 0x195   : > { %v803_v48 = vmul.f32 %v1043_v31, %v802_v38  ;;  %v815_v45 = vmul.f32 %v794_v42, %v775_v39 }
 0x197   : > { %v804_v47 = vadd.f32 %v1043_v31, %v803_v48  ;;  %v816_v49 = vadd.f32 %v815_v45, %v735_v41 }
 0x199   : > { %v808_v44 = vsel %vm807_vm14, %v1043_v31, %v804_v47  ;;  %1044 = vtanh.f32 %v816_v49 }
 0x19a   : > { %v813_v51 = vsel %vm810_vm15, %v812_v50, %v808_v44 }
 0x19b   : > { %v818_v52 = vsub.f32 1.0, %v813_v51  ;;  %v820_v55 = vmul.f32 %v1239_v1, %v813_v51 }
 0x19f   : > { %v1045_v53 = vpop.eup %1044 }
 0x1a0   : > { %v819_v54 = vmul.f32 %v1045_v53, %v818_v52  ;;  %129 = sbr.rel (!%p127_p0) target bundleno = 30 (0x1e), region = 86 }
 0x1a2   : > { %v821_v1 = vadd.f32 %v820_v55, %v819_v54  }
 0x1a4   : > { %823 = vst [vmem:[%s822_s18] sm:$0xff] %v821_v1  ;;  %v841_v1 = vld [vmem:[#allocation12 + $0x48] sm:$0xff] (%p127_p0) }
 0x1a5   :  { %962 = vmatpush.msra.mxu2 %v841_v1  ;;  %963 = vmatpush.msra.mxu3 %v841_v1 }
 0x1a6   :  { %858 = vmatpush.msra.mxu0 %v841_v1  ;;  %961 = vmatpush.msra.mxu1 %v841_v1 }
 0x1a7   :  { %965 = vmatpush.msra.mxu2 %v840_v61  ;;  %966 = vmatpush.msra.mxu3 %v840_v61 }
 0x1a8   :  { %859 = vmatpush.msra.mxu0 %v840_v61  ;;  %964 = vmatpush.msra.mxu1 %v840_v61 }
 0x1a9   :  { %968 = vmatpush.msra.mxu2 %v839_v63  ;;  %969 = vmatpush.msra.mxu3 %v839_v63 }
 0x1aa   :  { %860 = vmatpush.msra.mxu0 %v839_v63  ;;  %967 = vmatpush.msra.mxu1 %v839_v63 }
 0x1ab   :  { %971 = vmatpush.msra.mxu2 %v838_v3  ;;  %972 = vmatpush.msra.mxu3 %v838_v3  ;;  %v828_v9 = vld [vmem:[#allocation2 + $0x20] sm:$0xff]  ;;  %v830_v10 = vld [vmem:[#allocation2 + $0x30] sm:$0xff]  ;;  %v829_v13 = vld [vmem:[#allocation2 + $0x28] sm:$0xff] }
 0x1ac   :  { %861 = vmatpush.msra.mxu0 %v838_v3  ;;  %970 = vmatpush.msra.mxu1 %v838_v3  ;;  %v824_v11 = vld [vmem:[#allocation2] sm:$0xff]  ;;  %v826_v12 = vld [vmem:[#allocation2 + $0x10] sm:$0xff]  ;;  %v831_v14 = vld [vmem:[#allocation2 + $0x38] sm:$0xff] }
 0x1ad   :  { %974 = vmatpush.msra.mxu2 %v837_v4  ;;  %975 = vmatpush.msra.mxu3 %v837_v4  ;;  %v825_v15 = vld [vmem:[#allocation2 + $0x8] sm:$0xff]  ;;  %v827_v16 = vld [vmem:[#allocation2 + $0x18] sm:$0xff] }
 0x1ae   :  { %862 = vmatpush.msra.mxu0 %v837_v4  ;;  %973 = vmatpush.msra.mxu1 %v837_v4 }
 0x1af   :  { %977 = vmatpush.msra.mxu2 %v836_v62  ;;  %978 = vmatpush.msra.mxu3 %v836_v62 }
 0x1b0   :  { %863 = vmatpush.msra.mxu0 %v836_v62  ;;  %976 = vmatpush.msra.mxu1 %v836_v62 }
 0x1b1   :  { %980 = vmatpush.msra.mxu2 %v835_v5  ;;  %981 = vmatpush.msra.mxu3 %v835_v5 }
 0x1b2   :  { %864 = vmatpush.msra.mxu0 %v835_v5  ;;  %979 = vmatpush.msra.mxu1 %v835_v5 }
 0x1b3   :  { %983 = vmatpush.msra.mxu2 %v834_v6  ;;  %984 = vmatpush.msra.mxu3 %v834_v6 }
 0x1b4   :  { %865 = vmatpush.msra.mxu0 %v834_v6  ;;  %982 = vmatpush.msra.mxu1 %v834_v6 }
 0x1b5   :  { %986 = vmatpush.msra.mxu2 %v833_v7  ;;  %987 = vmatpush.msra.mxu3 %v833_v7 }
 0x1b6   :  { %866 = vmatpush.msra.mxu0 %v833_v7  ;;  %985 = vmatpush.msra.mxu1 %v833_v7 }
 0x1b7   :  { %989 = vmatpush.msra.mxu2 %v832_v8  ;;  %990 = vmatpush.msra.mxu3 %v832_v8 }
 0x1b8   :  { %880 = vmatmul.f32.vlgmr.msra.gmra.mxu2 %v828_v9  ;;  %886 = vmatmul.f32.vlgmr.msra.gmra.mxu3 %v830_v10 }
 0x1b9   :  { %867 = vmatpush.msra.mxu0 %v832_v8  ;;  %988 = vmatpush.msra.mxu1 %v832_v8 }
 0x1ba   :  { %868 = vmatmul.f32.vlgmr.msra.gmra.mxu0 %v824_v11  ;;  %874 = vmatmul.f32.vlgmr.msra.gmra.mxu1 %v826_v12 }
 0x1c0   :  { %883 = vmatmul.f32.gmra.mxu2 %v829_v13  ;;  %889 = vmatmul.f32.gmra.mxu3 %v831_v14 }
 0x1c2   :  { %871 = vmatmul.f32.gmra.mxu0 %v825_v15  ;;  %877 = vmatmul.f32.gmra.mxu1 %v827_v16 }
 0x237   :  { %v869_v17 = vpop.f32.mrf.mxu0  ;;  %v875_v18 = vpop.f32.mrf.mxu1 }
 0x238   :  { %v870_v19 = vadd.f32 %v1046_v2, %v869_v17  ;;  %v876_v20 = vadd.f32 %v1046_v2, %v875_v18 }
 0x23a   :  { %893 = vst [vmem:[#allocation14] sm:$0xff] %v870_v19 }
 0x23b   :  { %895 = vst [vmem:[#allocation14 + $0x10] sm:$0xff] %v876_v20  ;;  %v881_v21 = vpop.f32.mrf.mxu2  ;;  %v887_v22 = vpop.f32.mrf.mxu3 }
 0x23c   :  { %v882_v23 = vadd.f32 %v1046_v2, %v881_v21  ;;  %v888_v24 = vadd.f32 %v1046_v2, %v887_v22 }
 0x23e   :  { %897 = vst [vmem:[#allocation14 + $0x20] sm:$0xff] %v882_v23 }
 0x23f   :  { %899 = vst [vmem:[#allocation14 + $0x30] sm:$0xff] %v888_v24  ;;  %v872_v25 = vpop.f32.mrf.mxu0  ;;  %v878_v26 = vpop.f32.mrf.mxu1 }
 0x240   :  { %v873_v27 = vadd.f32 %v1046_v2, %v872_v25  ;;  %v879_v28 = vadd.f32 %v1046_v2, %v878_v26 }
 0x242   :  { %894 = vst [vmem:[#allocation14 + $0x8] sm:$0xff] %v873_v27 }
 0x243   :  { %896 = vst [vmem:[#allocation14 + $0x18] sm:$0xff] %v879_v28  ;;  %v884_v29 = vpop.f32.mrf.mxu2  ;;  %v890_v30 = vpop.f32.mrf.mxu3 }
 0x244   :  { %v885_v31 = vadd.f32 %v1046_v2, %v884_v29  ;;  %v891_v32 = vadd.f32 %v1046_v2, %v890_v30 }
 0x246   :  { %898 = vst [vmem:[#allocation14 + $0x28] sm:$0xff] %v885_v31 }
 0x247   :  { %900 = vst [vmem:[#allocation14 + $0x38] sm:$0xff] %v891_v32 }
 0x248   :  { %913 = dma.vmem_to_hbm [thread:$0]  %s906_s20, 1024, %s908_s21, [#allocation5], %s1250_s13, %s1250_s13, %s1251_s14  }
 0x249   :  { %1235 = dma.done.wait [#allocation5], 1024  }
 0x24a   :  { %1236 = vsyncadd [#allocation5], 4294966272 }
 0x24b   :  { %918 = vsyncpa [#allocation4], 1 }
 0x24c   :  { %919 = vsyncpa [#allocation7], 1 }
 0x24d   :  { %920 = vsyncpa [#allocation10], 1 }
 0x24e   :  { %921 = vsyncpa [#allocation13], 1 }
 0x24f   :  { %922 = vsyncpa [#allocation5], 1 }

</bundles_post_ra>
